<compile_context>
chip_gen: v7x
topology: tpu7x:2x2x1
jax: 0.10.0
libtpu: 0.0.40
codegen_flags: <defaults>
</compile_context>

<pallas_src>
import functools

import jax
import jax.numpy as jnp
from jax.experimental import pallas as pl
from jax.experimental.pallas import tpu as pltpu

_LANE = 128       # lane width — pad all feature dims to a multiple of this
_SUBLANE = 8      # sublane width — batch tile must be a multiple of this


def _round_up(x, m):
    return ((x + m - 1) // m) * m


# ----------------------------------------------------------------------------
# Kernel: one (TM, K) tile of x per grid step; weights/biases resident in VMEM.
# ----------------------------------------------------------------------------
def mlp_kernel(x_ref, w1_ref, b1_ref, w2_ref, b2_ref, w3_ref, b3_ref, o_ref):
    x = x_ref[...]                                                       # bf16 (TM, in_pad)
    h1 = jnp.dot(x, w1_ref[...], preferred_element_type=jnp.float32) + b1_ref[...]
    h1 = jnp.maximum(h1, 0.0).astype(x_ref.dtype)                        # ReLU, back to bf16
    h2 = jnp.dot(h1, w2_ref[...], preferred_element_type=jnp.float32) + b2_ref[...]
    h2 = jnp.maximum(h2, 0.0).astype(x_ref.dtype)                        # ReLU
    out = jnp.dot(h2, w3_ref[...], preferred_element_type=jnp.float32) + b3_ref[...]
    o_ref[...] = out.astype(o_ref.dtype)                                 # lane-dense f32 store


# ----------------------------------------------------------------------------
# One-time parameter glue (hoisted out of the per-call path):
# transpose PyTorch (out, in) -> (in, out), zero-pad to lane multiples, cast to bf16.
# ----------------------------------------------------------------------------
def prepare_params(params):
    def prep(w, b):
        out_f, in_f = w.shape
        in_p, out_p = _round_up(in_f, _LANE), _round_up(out_f, _LANE)
        w_t = jnp.zeros((in_p, out_p), jnp.float32).at[:in_f, :out_f].set(w.T)
        b_p = jnp.zeros((1, out_p), jnp.float32).at[0, :out_f].set(b)
        return w_t.astype(jnp.bfloat16), b_p  # weights bf16, biases f32

    w1, b1 = prep(params["w1"], params["b1"])
    w2, b2 = prep(params["w2"], params["b2"])
    w3, b3 = prep(params["w3"], params["b3"])
    return {
        "w1": w1, "b1": b1, "w2": w2, "b2": b2, "w3": w3, "b3": b3,
        "classes": int(params["w3"].shape[0]),  # static python int, used to slice output
    }


# ----------------------------------------------------------------------------
# Forward
# ----------------------------------------------------------------------------
@functools.partial(jax.jit, static_argnames=("classes", "tm"))
def _mlp_forward_impl(x, w1, b1, w2, b2, w3, b3, *, classes, tm):
    batch, in_f = x.shape
    in_pad = w1.shape[0]
    c_pad = w3.shape[1]

    # Batch tile: multiple of 8, capped at `tm` (256 default -> near HBM-roofline plateau).
    tm_eff = min(tm, _round_up(batch, _SUBLANE))
    batch_pad = _round_up(batch, tm_eff)

    # Zero-pad x to (batch_pad, in_pad) and cast matmul input to bf16.
    x_p = jnp.zeros((batch_pad, in_pad), jnp.bfloat16)
    x_p = x_p.at[:batch, :in_f].set(x.astype(jnp.bfloat16))

    grid = (batch_pad // tm_eff,)

    out = pl.pallas_call(
        mlp_kernel,
        out_shape=jax.ShapeDtypeStruct((batch_pad, c_pad), jnp.float32),
        grid=grid,
        in_specs=[
            pl.BlockSpec((tm_eff, in_pad), lambda i: (i, 0)),   # x: tiled over batch
            pl.BlockSpec(w1.shape, lambda i: (0, 0)),           # weights/biases: resident
            pl.BlockSpec(b1.shape, lambda i: (0, 0)),
            pl.BlockSpec(w2.shape, lambda i: (0, 0)),
            pl.BlockSpec(b2.shape, lambda i: (0, 0)),
            pl.BlockSpec(w3.shape, lambda i: (0, 0)),
            pl.BlockSpec(b3.shape, lambda i: (0, 0)),
        ],
        out_specs=pl.BlockSpec((tm_eff, c_pad), lambda i: (i, 0)),
        compiler_params=pltpu.CompilerParams(
            dimension_semantics=("parallel",),
        ),
    )(x_p, w1, b1, w2, b2, w3, b3)

    return out[:batch, :classes]


def mlp_forward(x, prepared, *, tm=256):
    return _mlp_forward_impl(
        x,
        prepared["w1"], prepared["b1"],
        prepared["w2"], prepared["b2"],
        prepared["w3"], prepared["b3"],
        classes=prepared["classes"], tm=tm,
    )


# ----------------------------------------------------------------------------
# Init mimicking nn.Linear's uniform(-1/sqrt(fan_in), 1/sqrt(fan_in))
# ----------------------------------------------------------------------------
def init_params(key, in_features, hidden1, hidden2, classes):
    ks = jax.random.split(key, 6)

    def linear_init(kw, kb, fan_in, fan_out):
        bound = 1.0 / jnp.sqrt(jnp.float32(fan_in))
        w = jax.random.uniform(kw, (fan_out, fan_in), jnp.float32, -bound, bound)
        b = jax.random.uniform(kb, (fan_out,), jnp.float32, -bound, bound)
        return w, b

    w1, b1 = linear_init(ks[0], ks[1], in_features, hidden1)
    w2, b2 = linear_init(ks[2], ks[3], hidden1, hidden2)
    w3, b3 = linear_init(ks[4], ks[5], hidden2, classes)
    return {"w1": w1, "b1": b1, "w2": w2, "b2": b2, "w3": w3, "b3": b3}


if __name__ == "__main__":
    key = jax.random.PRNGKey(0)
    k_x, k_p = jax.random.split(key)

    batch, in_features, hidden1, hidden2, classes = 2, 10, 32, 16, 4
    x = jax.random.normal(k_x, (batch, in_features), jnp.float32)
    params = init_params(k_p, in_features, hidden1, hidden2, classes)

    prepared = prepare_params(params)          # one-time transpose/pad/cast
    out = mlp_forward(x, prepared)
    out = jax.block_until_ready(out)

    # Pure-JAX f32 reference of the PyTorch forward semantics.
    def ref(x, p):
        h1 = jnp.maximum(x @ p["w1"].T + p["b1"], 0.0)
        h2 = jnp.maximum(h1 @ p["w2"].T + p["b2"], 0.0)
        return h2 @ p["w3"].T + p["b3"]

    expected = ref(x, params)
    assert out.shape == (batch, classes)
    # bf16 matmul inputs (f32 accumulation) -> loosened tolerance.
    assert jnp.allclose(out, expected, atol=2e-2, rtol=2e-2), float(
        jnp.max(jnp.abs(out - expected))
    )

    print("KERNEL_OK")
</pallas_src>

<mosaic_0001>
module attributes {stable_mosaic.version = 11 : i64} {
  func.func @mlp_kernel(%arg0: i32, %arg1: memref<8x128xbf16, #tpu.memory_space<vmem>>, %arg2: memref<128x128xbf16, #tpu.memory_space<vmem>>, %arg3: memref<1x128xf32, #tpu.memory_space<vmem>>, %arg4: memref<128x128xbf16, #tpu.memory_space<vmem>>, %arg5: memref<1x128xf32, #tpu.memory_space<vmem>>, %arg6: memref<128x128xbf16, #tpu.memory_space<vmem>>, %arg7: memref<1x128xf32, #tpu.memory_space<vmem>>, %arg8: memref<8x128xf32, #tpu.memory_space<vmem>>) attributes {dimension_semantics = [#tpu.dimension_semantics<parallel>], iteration_bounds = array<i64: 1>, scalar_prefetch = 0 : i64, scratch_operands = 0 : i64, tpu.core_type = #tpu.core_type<tc>, window_params = [{transform_indices = @transform_0, window_bounds = array<i64: 8, 128>}, {pipeline_mode = #tpu.pipeline_mode<synchronous>, transform_indices = @transform_1, window_bounds = array<i64: 128, 128>}, {pipeline_mode = #tpu.pipeline_mode<synchronous>, transform_indices = @transform_2, window_bounds = array<i64: 1, 128>}, {pipeline_mode = #tpu.pipeline_mode<synchronous>, transform_indices = @transform_3, window_bounds = array<i64: 128, 128>}, {pipeline_mode = #tpu.pipeline_mode<synchronous>, transform_indices = @transform_4, window_bounds = array<i64: 1, 128>}, {pipeline_mode = #tpu.pipeline_mode<synchronous>, transform_indices = @transform_5, window_bounds = array<i64: 128, 128>}, {pipeline_mode = #tpu.pipeline_mode<synchronous>, transform_indices = @transform_6, window_bounds = array<i64: 1, 128>}, {transform_indices = @transform_7, window_bounds = array<i64: 8, 128>}]} {
    %c0 = arith.constant 0 : index
    %c0_0 = arith.constant 0 : index
    %0 = vector.load %arg1[%c0, %c0_0] : memref<8x128xbf16, #tpu.memory_space<vmem>>, vector<8x128xbf16>
    %c0_1 = arith.constant 0 : index
    %c0_2 = arith.constant 0 : index
    %1 = vector.load %arg2[%c0_1, %c0_2] : memref<128x128xbf16, #tpu.memory_space<vmem>>, vector<128x128xbf16>
    %cst = arith.constant dense<0.000000e+00> : vector<8x128xf32>
    %2 = tpu.matmul %0, %1, %cst {dimension_numbers = #tpu.dot_dimension_numbers<[1], [0], [0], [1], [0, 0, 1, 1], [], []>} : vector<8x128xbf16>, vector<128x128xbf16>, vector<8x128xf32> -> vector<8x128xf32>
    %c0_3 = arith.constant 0 : index
    %c0_4 = arith.constant 0 : index
    %3 = vector.load %arg3[%c0_3, %c0_4] : memref<1x128xf32, #tpu.memory_space<vmem>>, vector<1x128xf32>
    %4 = vector.broadcast %3 : vector<1x128xf32> to vector<8x128xf32>
    %5 = arith.addf %2, %4 : vector<8x128xf32>
    %cst_5 = arith.constant 0.000000e+00 : f32
    %6 = vector.broadcast %cst_5 : f32 to vector<8x128xf32>
    %7 = arith.maximumf %5, %6 : vector<8x128xf32>
    %8 = arith.truncf %7 : vector<8x128xf32> to vector<8x128xbf16>
    %c0_6 = arith.constant 0 : index
    %c0_7 = arith.constant 0 : index
    %9 = vector.load %arg4[%c0_6, %c0_7] : memref<128x128xbf16, #tpu.memory_space<vmem>>, vector<128x128xbf16>
    %cst_8 = arith.constant dense<0.000000e+00> : vector<8x128xf32>
    %10 = tpu.matmul %8, %9, %cst_8 {dimension_numbers = #tpu.dot_dimension_numbers<[1], [0], [0], [1], [0, 0, 1, 1], [], []>} : vector<8x128xbf16>, vector<128x128xbf16>, vector<8x128xf32> -> vector<8x128xf32>
    %c0_9 = arith.constant 0 : index
    %c0_10 = arith.constant 0 : index
    %11 = vector.load %arg5[%c0_9, %c0_10] : memref<1x128xf32, #tpu.memory_space<vmem>>, vector<1x128xf32>
    %12 = vector.broadcast %11 : vector<1x128xf32> to vector<8x128xf32>
    %13 = arith.addf %10, %12 : vector<8x128xf32>
    %cst_11 = arith.constant 0.000000e+00 : f32
    %14 = vector.broadcast %cst_11 : f32 to vector<8x128xf32>
    %15 = arith.maximumf %13, %14 : vector<8x128xf32>
    %16 = arith.truncf %15 : vector<8x128xf32> to vector<8x128xbf16>
    %c0_12 = arith.constant 0 : index
    %c0_13 = arith.constant 0 : index
    %17 = vector.load %arg6[%c0_12, %c0_13] : memref<128x128xbf16, #tpu.memory_space<vmem>>, vector<128x128xbf16>
    %cst_14 = arith.constant dense<0.000000e+00> : vector<8x128xf32>
    %18 = tpu.matmul %16, %17, %cst_14 {dimension_numbers = #tpu.dot_dimension_numbers<[1], [0], [0], [1], [0, 0, 1, 1], [], []>} : vector<8x128xbf16>, vector<128x128xbf16>, vector<8x128xf32> -> vector<8x128xf32>
    %c0_15 = arith.constant 0 : index
    %c0_16 = arith.constant 0 : index
    %19 = vector.load %arg7[%c0_15, %c0_16] : memref<1x128xf32, #tpu.memory_space<vmem>>, vector<1x128xf32>
    %20 = vector.broadcast %19 : vector<1x128xf32> to vector<8x128xf32>
    %21 = arith.addf %18, %20 : vector<8x128xf32>
    %c0_17 = arith.constant 0 : index
    %c0_18 = arith.constant 0 : index
    %22 = vector.load %arg8[%c0_17, %c0_18] : memref<8x128xf32, #tpu.memory_space<vmem>>, vector<8x128xf32>
    tpu.vector_store %arg8[%c0_17, %c0_18], %21 {strides = array<i32>} : memref<8x128xf32, #tpu.memory_space<vmem>>, vector<8x128xf32>,
    return
  }
  func.func @transform_0(%arg0: i32) -> (i32, i32) {
    %c0_i32 = arith.constant 0 : i32
    %c0_i32_0 = arith.constant 0 : i32
    return %arg0, %c0_i32 : i32, i32
  }
  func.func @transform_1(%arg0: i32) -> (i32, i32) {
    %c0_i32 = arith.constant 0 : i32
    %c0_i32_0 = arith.constant 0 : i32
    %c0_i32_1 = arith.constant 0 : i32
    return %c0_i32, %c0_i32_0 : i32, i32
  }
  func.func @transform_2(%arg0: i32) -> (i32, i32) {
    %c0_i32 = arith.constant 0 : i32
    %c0_i32_0 = arith.constant 0 : i32
    %c0_i32_1 = arith.constant 0 : i32
    return %c0_i32, %c0_i32_0 : i32, i32
  }
  func.func @transform_3(%arg0: i32) -> (i32, i32) {
    %c0_i32 = arith.constant 0 : i32
    %c0_i32_0 = arith.constant 0 : i32
    %c0_i32_1 = arith.constant 0 : i32
    return %c0_i32, %c0_i32_0 : i32, i32
  }
  func.func @transform_4(%arg0: i32) -> (i32, i32) {
    %c0_i32 = arith.constant 0 : i32
    %c0_i32_0 = arith.constant 0 : i32
    %c0_i32_1 = arith.constant 0 : i32
    return %c0_i32, %c0_i32_0 : i32, i32
  }
  func.func @transform_5(%arg0: i32) -> (i32, i32) {
    %c0_i32 = arith.constant 0 : i32
    %c0_i32_0 = arith.constant 0 : i32
    %c0_i32_1 = arith.constant 0 : i32
    return %c0_i32, %c0_i32_0 : i32, i32
  }
  func.func @transform_6(%arg0: i32) -> (i32, i32) {
    %c0_i32 = arith.constant 0 : i32
    %c0_i32_0 = arith.constant 0 : i32
    %c0_i32_1 = arith.constant 0 : i32
    return %c0_i32, %c0_i32_0 : i32, i32
  }
  func.func @transform_7(%arg0: i32) -> (i32, i32) {
    %c0_i32 = arith.constant 0 : i32
    %c0_i32_0 = arith.constant 0 : i32
    return %arg0, %c0_i32 : i32, i32
  }
}

</mosaic_0001>

<bundles_post_ra>
// kernel: _mlp_forward_impl.1
= control target key start
LH: loop header
LB: loop body
LE: loop exit
PB: predicated region body
PF: predicated region fallthrough
CT: control target
= control target key end

     0   :  { %12 = vsyncpa [#allocation3], 0  ;;  %s772_s0 = inlined_call_operand.vmem [shape: bf16[8,128], index: 0, kind: input, shape index: {}]   ;;  %s773_s1 = inlined_call_operand.hbm [shape: bf16[128,128], index: 1, kind: input, shape index: {}]   ;;  %s774_s2 = inlined_call_operand.vmem [shape: f32[1,128], index: 2, kind: input, shape index: {}]   ;;  %s775_s3 = inlined_call_operand.hbm [shape: bf16[128,128], index: 3, kind: input, shape index: {}]   ;;  %s776_s4 = inlined_call_operand.vmem [shape: f32[1,128], index: 4, kind: input, shape index: {}]   ;;  %s777_s5 = inlined_call_operand.hbm [shape: bf16[128,128], index: 5, kind: input, shape index: {}]   ;;  %s778_s6 = inlined_call_operand.vmem [shape: f32[1,128], index: 6, kind: input, shape index: {}]   ;;  %s779_s7 = inlined_call_operand.vmem [shape: f32[8,128], index: 7, kind: output, shape index: {}]  }
   0x1   :  { %13 = vsyncpa [#allocation5], 0  ;;  %s628_s24 = smov [#allocation4]   ;;  %s629_s26 = smov [#allocation2]  }
   0x2   :  { %s35_s25 = sshll.u32 %s628_s24, 4  ;;  %s21_s27 = sshll.u32 %s629_s26, 4  ;;  %s36_s25 = int_to_ptr.vmem [resolvable:$true] %s35_s25  ;;  %s675_s27 = int_to_ptr.vmem [resolvable:$true] %s21_s27 }
   0x3   :  { %s558_s30 = scalar_lea.hbm %s775_s3, 1024 }
   0x4   :  { %p559_p0 = scmp.ne.s32.totalorder %s775_s3, %s558_s30  ;;  %p562_p1 = scmp.lt.u32.totalorder %s558_s30, %s775_s3 }
   0x6   :  { %p564_p2 = pnand %p562_p1, %p559_p0 }
   0x8   :  { %567 = shalt.err (!%p564_p2)
}
   0x9   :  { %s568_s12 = scalar_lea.vmem %s36_s25, 1024  ;;  %p573_p4 = scmp.lt.s32.totalorder %s36_s25, %s36_s25 }
   0xa   :  { %p569_p3 = scmp.ne.s32.totalorder %s36_s25, %s568_s12  ;;  %p574_p5 = scmp.lt.s32.totalorder %s568_s12, %s568_s12 }
   0xc   :  { %p575_p6 = por %p574_p5, %p573_p4 }
   0xe   :  { %p576_p7 = pnand %p575_p6, %p569_p3 }
  0x10   :  { %579 = shalt.err (!%p576_p7)
}
  0x11   :  { %s630_s13 = smov 64   ;;  %s631_s14 = smov 4  }
  0x12   :  { %41 = dma.hbm_to_vmem [thread:$0]  %s775_s3, 1024, %s36_s25, [#allocation5], %s630_s13, %s630_s13, %s631_s14  }
  0x13   :  { %s580_s19 = scalar_lea.hbm %s773_s1, 1024 }
  0x14   :  { %p581_p8 = scmp.ne.s32.totalorder %s773_s1, %s580_s19  ;;  %p584_p9 = scmp.lt.u32.totalorder %s580_s19, %s773_s1 }
  0x16   :  { %p586_p10 = pnand %p584_p9, %p581_p8 }
  0x18   :  { %589 = shalt.err (!%p586_p10)
}
  0x19   :  { %s590_s24 = scalar_lea.vmem %s675_s27, 1024  ;;  %p595_p12 = scmp.lt.s32.totalorder %s675_s27, %s675_s27 }
  0x1a   :  { %p591_p11 = scmp.ne.s32.totalorder %s675_s27, %s590_s24  ;;  %p596_p13 = scmp.lt.s32.totalorder %s590_s24, %s590_s24 }
  0x1c   :  { %p597_p0 = por %p596_p13, %p595_p12 }
  0x1e   :  { %p598_p1 = pnand %p597_p0, %p591_p11 }
  0x20   :  { %601 = shalt.err (!%p598_p1)
}
  0x21   :  { %27 = dma.hbm_to_vmem [thread:$0]  %s773_s1, 1024, %s675_s27, [#allocation3], %s630_s13, %s630_s13, %s631_s14  }
  0x22   :  { %s632_s26 = smov [#allocation6]   ;;  %s602_s8 = scalar_lea.hbm %s777_s5, 1024 }
  0x23   :  { %s49_s28 = sshll.u32 %s632_s26, 4  ;;  %p603_p2 = scmp.ne.s32.totalorder %s777_s5, %s602_s8  ;;  %s50_s28 = int_to_ptr.vmem [resolvable:$true] %s49_s28 }
  0x24   :  { %p606_p3 = scmp.lt.u32.totalorder %s602_s8, %s777_s5 }
  0x26   :  { %p608_p4 = pnand %p606_p3, %p603_p2 }
  0x28   :  { %611 = shalt.err (!%p608_p4)
}
  0x29   :  { %s612_s15 = scalar_lea.vmem %s50_s28, 1024  ;;  %p617_p6 = scmp.lt.s32.totalorder %s50_s28, %s50_s28 }
  0x2a   :  { %p613_p5 = scmp.ne.s32.totalorder %s50_s28, %s612_s15  ;;  %p618_p7 = scmp.lt.s32.totalorder %s612_s15, %s612_s15 }
  0x2c   :  { %p619_p8 = por %p618_p7, %p617_p6 }
  0x2e   :  { %p620_p9 = pnand %p619_p8, %p613_p5 }
  0x30   :  { %623 = shalt.err (!%p620_p9)
}
  0x31   :  { %55 = dma.hbm_to_vmem [thread:$0]  %s777_s5, 1024, %s50_s28, [#allocation5], %s630_s13, %s630_s13, %s631_s14  }
  0x32   :  { %624 = dma.done.wait [#allocation3], 1024  }
  0x33   :  { %625 = vsyncadd [#allocation3], 4294966272 }
  0x34   :  { %626 = dma.done.wait [#allocation5], 2048  }
  0x35   :  { %627 = vsyncadd [#allocation5], 4294965248  ;;  %v633_v0 = vmov 0.0   ;;  %vm634_vm0 = vmmov 0   ;;  %v534_v1 = vld [vmem:[#allocation2] sm:$0xff]   ;;  %v535_v2 = vld [vmem:[#allocation2 + $0x8] sm:$0xff]  }
  0x36   :  { %467 = vmatprep.subr.bf16.mxu0 %v633_v0  ;;  %483 = vmatprep.mubr.msk.bf16.mxu0 %vm634_vm0, %v633_v0  ;;  %v536_v3 = vld [vmem:[#allocation2 + $0x10] sm:$0xff]   ;;  %v542_v4 = vld [vmem:[#allocation4] sm:$0xff]   ;;  %v537_v5 = vld [vmem:[#allocation2 + $0x18] sm:$0xff]  }
  0x37   :  { %487 = vmatprep.subr.bf16.mxu1 %v633_v0  ;;  %503 = vmatprep.mubr.msk.bf16.mxu1 %vm634_vm0, %v633_v0  ;;  %v543_v6 = vld [vmem:[#allocation4 + $0x8] sm:$0xff]   ;;  %v538_v7 = vld [vmem:[#allocation2 + $0x20] sm:$0xff]   ;;  %v544_v8 = vld [vmem:[#allocation4 + $0x10] sm:$0xff]  }
  0x38   :  { %468 = vmatpush3.bf16.msra.mxu0 %v534_v1  ;;  %488 = vmatpush3.bf16.msra.mxu1 %v542_v4  ;;  %v539_v9 = vld [vmem:[#allocation2 + $0x28] sm:$0xff]   ;;  %v545_v10 = vld [vmem:[#allocation4 + $0x18] sm:$0xff]   ;;  %v540_v11 = vld [vmem:[#allocation2 + $0x30] sm:$0xff]  }
  0x39   :  { %469 = vmatprep.subr.bf16.mxu0 %v633_v0  ;;  %489 = vmatprep.subr.bf16.mxu1 %v633_v0  ;;  %v546_v12 = vld [vmem:[#allocation4 + $0x20] sm:$0xff]   ;;  %v541_v13 = vld [vmem:[#allocation2 + $0x38] sm:$0xff]   ;;  %v547_v14 = vld [vmem:[#allocation4 + $0x28] sm:$0xff]  }
  0x3a   :  { %v68_v15 = vld [vmem:[%s772_s0] sm:$0xf]  ;;  %v548_v16 = vld [vmem:[#allocation4 + $0x30] sm:$0xff]   ;;  %v549_v17 = vld [vmem:[#allocation4 + $0x38] sm:$0xff]  }
  0x3b   :  { %v550_v18 = vld [vmem:[#allocation6] sm:$0xff]   ;;  %v551_v19 = vld [vmem:[#allocation6 + $0x8] sm:$0xff]   ;;  %v552_v20 = vld [vmem:[#allocation6 + $0x10] sm:$0xff]  }
  0x3c   :  { %470 = vmatpush3.bf16.msra.mxu0 %v535_v2  ;;  %490 = vmatpush3.bf16.msra.mxu1 %v543_v6  ;;  %v553_v21 = vld [vmem:[#allocation6 + $0x18] sm:$0xff]   ;;  %v554_v22 = vld [vmem:[#allocation6 + $0x20] sm:$0xff]   ;;  %v555_v23 = vld [vmem:[#allocation6 + $0x28] sm:$0xff]  }
  0x3d   :  { %471 = vmatprep.subr.bf16.mxu0 %v633_v0  ;;  %491 = vmatprep.subr.bf16.mxu1 %v633_v0  ;;  %v413_v24 = vld [vmem:[%s774_s2] ss:$0 sm:$0xff]  ;;  %v556_v32 = vld [vmem:[#allocation6 + $0x30] sm:$0xff]   ;;  %v557_v33 = vld [vmem:[#allocation6 + $0x38] sm:$0xff]  }
  0x3e   :  { %v422_v34 = vld [vmem:[%s776_s4] ss:$0 sm:$0xff] }
  0x3f   :  { %v431_v42 = vld [vmem:[%s778_s6] ss:$0 sm:$0xff] }
  0x40   :  { %472 = vmatpush3.bf16.msra.mxu0 %v536_v3  ;;  %492 = vmatpush3.bf16.msra.mxu1 %v544_v8 }
  0x41   :  { %473 = vmatprep.subr.bf16.mxu0 %v633_v0  ;;  %493 = vmatprep.subr.bf16.mxu1 %v633_v0 }
  0x44   :  { %474 = vmatpush3.bf16.msra.mxu0 %v537_v5  ;;  %494 = vmatpush3.bf16.msra.mxu1 %v545_v10 }
  0x45   :  { %475 = vmatprep.subr.bf16.mxu0 %v633_v0  ;;  %495 = vmatprep.subr.bf16.mxu1 %v633_v0 }
  0x48   :  { %476 = vmatpush3.bf16.msra.mxu0 %v538_v7  ;;  %496 = vmatpush3.bf16.msra.mxu1 %v546_v12 }
  0x49   :  { %477 = vmatprep.subr.bf16.mxu0 %v633_v0  ;;  %497 = vmatprep.subr.bf16.mxu1 %v633_v0 }
  0x4c   :  { %478 = vmatpush3.bf16.msra.mxu0 %v539_v9  ;;  %498 = vmatpush3.bf16.msra.mxu1 %v547_v14 }
  0x4d   :  { %479 = vmatprep.subr.bf16.mxu0 %v633_v0  ;;  %499 = vmatprep.subr.bf16.mxu1 %v633_v0 }
  0x50   :  { %480 = vmatpush3.bf16.msra.mxu0 %v540_v11  ;;  %500 = vmatpush3.bf16.msra.mxu1 %v548_v16 }
  0x51   :  { %481 = vmatprep.subr.bf16.mxu0 %v633_v0  ;;  %501 = vmatprep.subr.bf16.mxu1 %v633_v0 }
  0x54   :  { %482 = vmatpush3.bf16.msra.mxu0 %v541_v13  ;;  %502 = vmatpush3.bf16.msra.mxu1 %v549_v17 }
  0x55   :  { %507 = vmatprep.subr.bf16.mxu0 %v633_v0 }
  0x57   :  { %484 = vmatmul.mubr.bf16.vlgmr.msra.gmra.mrb[0].mxu0 %v68_v15 }
  0x58   :  { %523 = vmatprep.mubr.msk.bf16.mxu0 %vm634_vm0, %v633_v0  ;;  %508 = vmatpush3.bf16.msra.mxu0 %v550_v18 }
  0x59   :  { %509 = vmatprep.subr.bf16.mxu0 %v633_v0 }
  0x5c   :  { %510 = vmatpush3.bf16.msra.mxu0 %v551_v19 }
  0x5d   :  { %511 = vmatprep.subr.bf16.mxu0 %v633_v0 }
  0x60   :  { %512 = vmatpush3.bf16.msra.mxu0 %v552_v20 }
  0x61   :  { %513 = vmatprep.subr.bf16.mxu0 %v633_v0 }
  0x64   :  { %514 = vmatpush3.bf16.msra.mxu0 %v553_v21 }
  0x65   :  { %515 = vmatprep.subr.bf16.mxu0 %v633_v0 }
  0x68   :  { %516 = vmatpush3.bf16.msra.mxu0 %v554_v22 }
  0x69   :  { %517 = vmatprep.subr.bf16.mxu0 %v633_v0 }
  0x6c   :  { %518 = vmatpush3.bf16.msra.mxu0 %v555_v23 }
  0x6d   :  { %519 = vmatprep.subr.bf16.mxu0 %v633_v0 }
  0x70   :  { %520 = vmatpush3.bf16.msra.mxu0 %v556_v32 }
  0x71   :  { %521 = vmatprep.subr.bf16.mxu0 %v633_v0 }
  0x74   :  { %522 = vmatpush3.bf16.msra.mxu0 %v557_v33 }
 0x12a   :  { %v174_v25 = vpop.f32.mrb[0].mxu0 }
 0x12b   :  { %v175_v26 = vadd.f32 %v413_v24, %v174_v25  ;;  %v485_v27 = vpop.f32.mrb[1].mxu0 }
 0x12c   :  { %v177_v28 = vpop.f32.mrb[2].mxu0 }
 0x12d   :  { %v180_v29 = vmax.f32 %v175_v26, 0.0  ;;  %v486_v30 = vpop.f32.mrb[3].mxu0 }
 0x12f   :  { %v181_v31 = vpack.c.bf16 %v180_v29, %v180_v29 }
 0x131   :  { %504 = vmatmul.mubr.bf16.vlgmr.msra.gmra.mrb[0].mxu1 %v181_v31 }
 0x204   :  { %v287_v35 = vpop.f32.mrb[0].mxu1 }
 0x205   :  { %v288_v36 = vadd.f32 %v422_v34, %v287_v35  ;;  %v505_v37 = vpop.f32.mrb[1].mxu1 }
 0x206   :  { %v290_v38 = vpop.f32.mrb[2].mxu1 }
 0x207   :  { %v293_v39 = vmax.f32 %v288_v36, 0.0  ;;  %v506_v40 = vpop.f32.mrb[3].mxu1 }
 0x209   :  { %v294_v41 = vpack.c.bf16 %v293_v39, %v293_v39 }
 0x20b   :  { %524 = vmatmul.mubr.bf16.vlgmr.msra.gmra.mrb[4].mxu0 %v294_v41 }
 0x2de   :  { %v400_v43 = vpop.f32.mrb[4].mxu0 }
 0x2df   :  { %v401_v44 = vadd.f32 %v431_v42, %v400_v43  ;;  %v525_v45 = vpop.f32.mrb[5].mxu0 }
 0x2e0   :  { %v403_v46 = vpop.f32.mrb[6].mxu0 }
 0x2e1   :  { %406 = vst [vmem:[%s779_s7] sm:$0xff] %v401_v44  ;;  %v526_v47 = vpop.f32.mrb[7].mxu0 }
 0x2e2   :  { %411 = vsyncpa [#allocation3], 1 }
 0x2e3   :  { %412 = vsyncpa [#allocation5], 1 }

</bundles_post_ra>
